<compile_context>
chip_gen: v6e
topology: v6e:2x2x1
jax: 0.10.0
libtpu: 0.0.40
codegen_flags: <defaults>
</compile_context>

<pallas_src>
import functools

import jax
import jax.numpy as jnp
from jax.experimental import pallas as pl
from jax.experimental.pallas import tpu as pltpu


def _round_up(x, m):
    return ((x + m - 1) // m) * m


def _depot_masked_demand(d_ref, tm, n_nodes):
    """(TM, 1) demand tile in f32 with depot rows (global_row % N == 0) zeroed."""
    d = d_ref[...].astype(jnp.float32)                                   # (TM, 1)
    row0 = pl.program_id(0) * tm
    rows = row0 + jax.lax.broadcasted_iota(jnp.int32, (tm, 1), 0)
    return jnp.where(rows % n_nodes == 0, jnp.float32(0.0), d)


def _sdvrp_kernel_fused(d_ref, w_ref, o_ref, *, tm, n_nodes, e3):
    # d_ref: (TM, 1) demand; w_ref: (1, 3E) f32; o_ref: (TM, 3E)
    d = _depot_masked_demand(d_ref, tm, n_nodes)
    db = jnp.broadcast_to(d, (tm, e3))            # hoisted lane-broadcast (once)
    o_ref[...] = (db * w_ref[...]).astype(o_ref.dtype)


def _sdvrp_kernel_split(d_ref, w_ref, gk_ref, gv_ref, lk_ref, *, tm, n_nodes, e):
    # d_ref: (TM, 1) demand; w_ref: (3, E) f32; outputs: (TM, E) each
    d = _depot_masked_demand(d_ref, tm, n_nodes)
    db = jnp.broadcast_to(d, (tm, e))             # hoisted, reused for all 3 products
    gk_ref[...] = (db * w_ref[0:1, :]).astype(gk_ref.dtype)
    gv_ref[...] = (db * w_ref[1:2, :]).astype(gv_ref.dtype)
    lk_ref[...] = (db * w_ref[2:3, :]).astype(lk_ref.dtype)


def sdvrp_dynamic_embedding(demand_with_depot, weight, embedding_dim, out_dtype=None):
    """demand_with_depot: [B, N]; weight: [3E, 1] (PyTorch nn.Linear layout).

    Returns (glimpse_key, glimpse_val, logit_key), each [B, N, E].
    """
    B, N = demand_with_depot.shape
    E = int(embedding_dim)
    assert weight.shape == (3 * E, 1)
    out_dtype = demand_with_depot.dtype if out_dtype is None else jnp.dtype(out_dtype)
    out_bytes = jnp.dtype(out_dtype).itemsize
    in_bytes = jnp.dtype(demand_with_depot.dtype).itemsize

    rows = B * N
    rows_p = _round_up(max(rows, 8), 8)

    d_flat = demand_with_depot.reshape(rows, 1)
    if rows_p != rows:
        d_flat = jnp.pad(d_flat, ((0, rows_p - rows), (0, 0)))

    # --- Adaptive row tile ------------------------------------------------
    # Double-buffered output + lane-padded demand buffer per row, against a
    # ~20 MiB budget (fits v7x's 64 MiB/TC with headroom).
    per_row_bytes = 2 * 3 * E * out_bytes + 2 * 512
    budget_bytes = 20 * 1024 * 1024
    tm_vmem = max(8, (budget_bytes // per_row_bytes) // 8 * 8)
    tm_cap = 4096                                   # per-step overhead already amortized
    tm_par = max(8, _round_up(pl.cdiv(rows_p, 4), 8))  # keep >=~4 steps for v7x megacore
    TM = max(8, min(tm_vmem, tm_cap, tm_par, rows_p))
    grid = (pl.cdiv(rows_p, TM),)

    w_f32 = weight.astype(jnp.float32)              # keep weight/compute in f32

    cost = pl.CostEstimate(
        flops=3 * rows_p * E,
        transcendentals=0,
        bytes_accessed=rows_p * in_bytes + 3 * E * 4 + 3 * rows_p * E * out_bytes,
    )
    cparams = pltpu.CompilerParams(
        dimension_semantics=("parallel",),
        vmem_limit_bytes=32 * 1024 * 1024,
    )

    if E % 128 != 0:
        # Fused (rows, 3E) output: one wide store / one output DMA per step.
        kernel = functools.partial(_sdvrp_kernel_fused, tm=TM, n_nodes=N, e3=3 * E)
        out = pl.pallas_call(
            kernel,
            out_shape=jax.ShapeDtypeStruct((rows_p, 3 * E), out_dtype),
            grid_spec=pltpu.PrefetchScalarGridSpec(
                num_scalar_prefetch=0,
                grid=grid,
                in_specs=[
                    pl.BlockSpec((TM, 1), lambda i: (i, 0)),      # demand rows on sublanes
                    pl.BlockSpec((1, 3 * E), lambda i: (0, 0)),   # weight resident
                ],
                out_specs=pl.BlockSpec((TM, 3 * E), lambda i: (i, 0)),
            ),
            compiler_params=cparams,
            cost_estimate=cost,
        )(d_flat, w_f32.reshape(1, 3 * E))
        if rows_p != rows:
            out = out[:rows]
        out = out.reshape(B, N, 3 * E)
        gk, gv, lk = jnp.split(out, 3, axis=-1)
        return gk, gv, lk

    # E is a multiple of 128: three separate, lane-dense outputs (no wrapper split).
    kernel = functools.partial(_sdvrp_kernel_split, tm=TM, n_nodes=N, e=E)
    out_spec = pl.BlockSpec((TM, E), lambda i: (i, 0))
    gk, gv, lk = pl.pallas_call(
        kernel,
        out_shape=tuple(jax.ShapeDtypeStruct((rows_p, E), out_dtype) for _ in range(3)),
        grid_spec=pltpu.PrefetchScalarGridSpec(
            num_scalar_prefetch=0,
            grid=grid,
            in_specs=[
                pl.BlockSpec((TM, 1), lambda i: (i, 0)),
                pl.BlockSpec((3, E), lambda i: (0, 0)),
            ],
            out_specs=(out_spec, out_spec, out_spec),
        ),
        compiler_params=cparams,
        cost_estimate=cost,
    )(d_flat, w_f32.reshape(3, E))
    if rows_p != rows:
        gk, gv, lk = gk[:rows], gv[:rows], lk[:rows]
    return (gk.reshape(B, N, E), gv.reshape(B, N, E), lk.reshape(B, N, E))


def _reference(demand_with_depot, weight):
    d = demand_with_depot[..., None]
    d = d.at[:, 0, :].set(0.0)
    out = jnp.einsum("bni,oi->bno", d, weight)
    return jnp.split(out, 3, axis=-1)


if __name__ == "__main__":
    key = jax.random.PRNGKey(0)
    k_demand, k_w, k_w2 = jax.random.split(key, 3)

    # --- small demo shapes (node 0 is the depot) ---------------------------
    B, N = 2, 8
    E = 32
    demand_with_depot = jax.random.uniform(k_demand, (B, N), dtype=jnp.float32)
    weight = jax.random.normal(k_w, (3 * E, 1), dtype=jnp.float32) * 0.1

    gk, gv, lk = sdvrp_dynamic_embedding(demand_with_depot, weight, E)
    jax.block_until_ready((gk, gv, lk))

    ref_gk, ref_gv, ref_lk = _reference(demand_with_depot, weight)
    assert gk.shape == (B, N, E) and gv.shape == (B, N, E) and lk.shape == (B, N, E)
    assert jnp.allclose(gk, ref_gk, atol=1e-5)
    assert jnp.allclose(gv, ref_gv, atol=1e-5)
    assert jnp.allclose(lk, ref_lk, atol=1e-5)

    # --- exercise the lane-dense (E % 128 == 0) split path too -------------
    E2 = 128
    weight2 = jax.random.normal(k_w2, (3 * E2, 1), dtype=jnp.float32) * 0.1
    gk2, gv2, lk2 = sdvrp_dynamic_embedding(demand_with_depot, weight2, E2)
    jax.block_until_ready((gk2, gv2, lk2))
    r_gk2, r_gv2, r_lk2 = _reference(demand_with_depot, weight2)
    assert jnp.allclose(gk2, r_gk2, atol=1e-5)
    assert jnp.allclose(gv2, r_gv2, atol=1e-5)
    assert jnp.allclose(lk2, r_lk2, atol=1e-5)

    # --- bf16 output smoke run (halves HBM write traffic downstream) -------
    out_bf16 = sdvrp_dynamic_embedding(demand_with_depot, weight, E, out_dtype=jnp.bfloat16)
    jax.block_until_ready(out_bf16)

    print("KERNEL_OK")
</pallas_src>

<mosaic_0001>
module attributes {stable_mosaic.version = 11 : i64} {
  func.func @_sdvrp_kernel_fused(%arg0: i32, %arg1: memref<8x1xf32, #tpu.memory_space<vmem>>, %arg2: memref<1x96xf32, #tpu.memory_space<vmem>>, %arg3: memref<8x96xf32, #tpu.memory_space<vmem>>) attributes {dimension_semantics = [#tpu.dimension_semantics<parallel>], iteration_bounds = array<i64: 2>, scalar_prefetch = 0 : i64, scratch_operands = 0 : i64, tpu.core_type = #tpu.core_type<tc>, window_params = [{transform_indices = @transform_0, window_bounds = array<i64: 8, 1>}, {pipeline_mode = #tpu.pipeline_mode<synchronous>, transform_indices = @transform_1, window_bounds = array<i64: 1, 96>}, {transform_indices = @transform_2, window_bounds = array<i64: 8, 96>}]} {
    %c0 = arith.constant 0 : index
    %c0_0 = arith.constant 0 : index
    %0 = vector.load %arg1[%c0, %c0_0] : memref<8x1xf32, #tpu.memory_space<vmem>>, vector<8x1xf32>
    %c8_i32 = arith.constant 8 : i32
    %1 = arith.muli %arg0, %c8_i32 : i32
    %2 = tpu.iota {dimensions = array<i32: 0>} : vector<8x1xi32>
    %3 = vector.broadcast %1 : i32 to vector<8x1xi32>
    %4 = arith.addi %3, %2 : vector<8x1xi32>
    %c8_i32_1 = arith.constant 8 : i32
    %c0_i32 = arith.constant 0 : i32
    %5 = arith.cmpi eq, %c8_i32_1, %c0_i32 : i32
    %c1_i32 = arith.constant 1 : i32
    %6 = arith.select %5, %c1_i32, %c8_i32_1 : i32
    %7 = vector.broadcast %6 : i32 to vector<8x1xi32>
    %8 = arith.remsi %4, %7 : vector<8x1xi32>
    %c0_i32_2 = arith.constant 0 : i32
    %9 = vector.broadcast %c0_i32_2 : i32 to vector<8x1xi32>
    %10 = arith.cmpi ne, %8, %9 : vector<8x1xi32>
    %c0_i32_3 = arith.constant 0 : i32
    %11 = vector.broadcast %c0_i32_3 : i32 to vector<8x1xi32>
    %12 = arith.cmpi slt, %8, %11 : vector<8x1xi32>
    %c0_i32_4 = arith.constant 0 : i32
    %13 = arith.cmpi slt, %6, %c0_i32_4 : i32
    %14 = vector.broadcast %13 : i1 to vector<8x1xi1>
    %15 = vector.broadcast %14 : vector<8x1xi1> to vector<8x1xi1>
    %16 = arith.xori %12, %15 : vector<8x1xi1>
    %17 = arith.andi %16, %10 : vector<8x1xi1>
    %18 = vector.broadcast %6 : i32 to vector<8x1xi32>
    %19 = arith.addi %8, %18 : vector<8x1xi32>
    %20 = arith.select %17, %19, %8 : vector<8x1xi1>, vector<8x1xi32>
    %c0_i32_5 = arith.constant 0 : i32
    %21 = vector.broadcast %c0_i32_5 : i32 to vector<8x1xi32>
    %22 = arith.cmpi eq, %20, %21 : vector<8x1xi32>
    %cst = arith.constant 0.000000e+00 : f32
    %23 = vector.broadcast %cst : f32 to vector<8x1xf32>
    %24 = arith.select %22, %23, %0 : vector<8x1xi1>, vector<8x1xf32>
    %25 = vector.shape_cast %24 : vector<8x1xf32> to vector<8x1xf32>
    %26 = vector.broadcast %25 : vector<8x1xf32> to vector<8x96xf32>
    %c0_6 = arith.constant 0 : index
    %c0_7 = arith.constant 0 : index
    %27 = vector.load %arg2[%c0_6, %c0_7] : memref<1x96xf32, #tpu.memory_space<vmem>>, vector<1x96xf32>
    %28 = vector.broadcast %27 : vector<1x96xf32> to vector<8x96xf32>
    %29 = arith.mulf %26, %28 : vector<8x96xf32>
    %c0_8 = arith.constant 0 : index
    %c0_9 = arith.constant 0 : index
    %30 = vector.load %arg3[%c0_8, %c0_9] : memref<8x96xf32, #tpu.memory_space<vmem>>, vector<8x96xf32>
    tpu.vector_store %arg3[%c0_8, %c0_9], %29 {strides = array<i32>} : memref<8x96xf32, #tpu.memory_space<vmem>>, vector<8x96xf32>,
    return
  }
  func.func @transform_0(%arg0: i32) -> (i32, i32) {
    %c0_i32 = arith.constant 0 : i32
    %c0_i32_0 = arith.constant 0 : i32
    return %arg0, %c0_i32 : i32, i32
  }
  func.func @transform_1(%arg0: i32) -> (i32, i32) {
    %c0_i32 = arith.constant 0 : i32
    %c0_i32_0 = arith.constant 0 : i32
    %c0_i32_1 = arith.constant 0 : i32
    return %c0_i32, %c0_i32_0 : i32, i32
  }
  func.func @transform_2(%arg0: i32) -> (i32, i32) {
    %c0_i32 = arith.constant 0 : i32
    %c0_i32_0 = arith.constant 0 : i32
    return %arg0, %c0_i32 : i32, i32
  }
}

</mosaic_0001>

<bundles_post_ra>
// kernel: tpu_custom_call.1
= control target key start
LH: loop header
LB: loop body
LE: loop exit
PB: predicated region body
PF: predicated region fallthrough
CT: control target
= control target key end

     0   :  { %7 = vsyncpa [#allocation3], 0  ;;  %s471_s0 = inlined_call_operand.vmem [shape: f32[16,1], index: 0, kind: input, shape index: {}]   ;;  %s472_s1 = inlined_call_operand.vmem [shape: f32[1,96], index: 1, kind: input, shape index: {}]   ;;  %s473_s2 = inlined_call_operand.hbm [shape: f32[16,96], index: 2, kind: output, shape index: {}]  }
   0x1   :  { %9 = vsyncpa [#allocation3 + $0x1], 0  ;;  %s380_s9 = smov 0   ;;  %s382_s10 = smov 0  }
   0x2   :  { %s384_s11 = smov 0   ;;  %s386_s12 = smov 0  }
   0x3 LB: > { %s401_s13 = sadd.s32 4294967295, %s361_s12   ;;  %s247_s14 = sadd.s32 4294967294, %s361_s12   ;;  %s361_s12 = sphi %s386_s12, %s479_s12   ;;  %s357_s11 = sphi %s384_s11, %s478_s11   ;;  %s353_s10 = sphi %s382_s10, %s477_s10   ;;  %s349_s9 = sphi %s380_s9, %s476_s9  }
   0x4   : > { %s405_s15 = sadd.s32 1, %s361_s12   ;;  %s69_s16 = sadd.s32 1, %s357_s11 }
   0x5   : > { %s66_s17 = ssub.s32 %s361_s12, %s405_s15  ;;  %p79_p0 = scmp.ne.s32.totalorder %s357_s11, %s353_s10 }
   0x6   : > { %p67_p1 = scmp.eq.s32.totalorder %s66_s17, 0  ;;  %p80_p2 = scmp.eq.s32.totalorder %s401_s13, 1 }
   0x7   : > { %p85_p3 = scmp.ne.s32.totalorder %s353_s10, %s349_s9  ;;  %p86_p4 = scmp.eq.s32.totalorder %s247_s14, 1 }
   0x8   : > { %s416_s18 = scalar_select %p67_p1, %s357_s11, %s69_s16  }
   0x9   : > { %p418_p5 = por %p80_p2, %p79_p0  ;;  %p422_p6 = por %p86_p4, %p85_p3 }
   0xa   : > { %p250_p7 = scmp.ge.s32.totalorder %s361_s12, 1  ;;  %p114_p8 = scmp.lt.s32.totalorder %s361_s12, 3 }
   0xc   : > { %p115_p9 = pnand %p250_p7, %p114_p8 }
   0xd   : > { %s253_s21 = sshll.u32 (!%p115_p9), %s401_s13, 3  ;;  %p135_p10 = scmp.lt.s32.totalorder (!%p115_p9), %s401_s13, 1 }
   0xe   : > { %118 = sbr.rel (%p115_p9) target bundleno = 178 (0xb2), region = 28  ;;  %s132_s27 = sand.u32 (!%p115_p9), 1, %s353_s10  }
   0xf   : > { %s251_s28 = sshll.u32 (!%p115_p9), %s132_s27, 3  ;;  %s257_s3 = sshll.u32 (!%p115_p9), %s401_s13, 7 }
  0x10   : > { %s134_s4 = scalar_lea.vmem (!%p115_p9), [#allocation2], %s251_s28  ;;  %s186_s8 = scalar_lea.hbm (!%p115_p9), %s473_s2, %s257_s3 }
  0x11   : > { %s188_s5 = sshll.u32 (!%p115_p9), %s134_s4, 4  ;;  %s175_s14 = scalar_lea.sflag (!%p115_p9), [#allocation3], %s132_s27  ;;  %s189_s5 = int_to_ptr.vmem [resolvable:$true] %s188_s5 }
  0x12   : > { %s301_s16 = scalar_lea.vmem (!%p115_p9), %s189_s5, 128  ;;  %s364_s17 = smov (!%p115_p9), [#allocation2]  }
  0x13   : > { %v141_v0 = vlaneseq  ;;  %v363_v1 = vmov 0   ;;  %v143_v2 = vstv %s253_s21  ;;  %s136_s22 = scalar_select %p135_p10, %s401_s13, 1  ;;  %v255_v14 = vld [vmem:[%s472_s1] ss:$0 sm:$0xff]  ;;  %vm172_vm5 = vcmask 785408  }
  0x14   : > { %300 = vset.pattern.permute.xlu0 %v363_v1  ;;  %p302_p11 = scmp.ne.s32.totalorder %s189_s5, %s301_s16  ;;  %s305_s21 = sshll.u32 %s364_s17, 4  ;;  %s306_s21 = int_to_ptr.vmem [resolvable:$false] %s305_s21 }
  0x15   : > { %v142_v3 = vshrl.u32 %v141_v0, 7  ;;  %s252_s23 = sshll.u32 %s136_s22, 3  ;;  %s307_s13 = scalar_lea.vmem %s306_s21, 256 }
  0x16   : > { %s138_s26 = scalar_lea.vmem %s471_s0, %s252_s23  ;;  %p303_p12 = pnand %p302_p11, %p418_p5 }
  0x17   : > { %v144_v4 = vadd.s32 %v143_v2, %v142_v3  ;;  %v139_v11 = vld [vmem:[%s138_s26] sm:$0xff]  ;;  %p308_p0 = scmp.lt.s32.totalorder %s189_s5, %s306_s21  ;;  %p309_p1 = scmp.lt.s32.totalorder %s307_s13, %s301_s16 }
  0x18   : > { %p304_p13 = pneg %p303_p12 }
  0x19   : > { %v146_v5 = vsub.s32 0, %v144_v4  ;;  %vm145_vm0 = vcmp.lt.s32.totalorder %v144_v4, 0  ;;  %p310_p2 = por %p309_p1, %p308_p0 }
  0x1b   : > { %v254_v6 = vmin.u32 %v146_v5, %v144_v4  ;;  %p311_p3 = pnand %p310_p2, %p304_p13 }
  0x1d   : > { %v149_v7 = vand.u32 7, %v254_v6 }
  0x1f   : > { %v150_v8 = vsub.s32 0, %v149_v7 }
  0x21   : > { %v151_v9 = vsel %vm145_vm0, %v150_v8, %v149_v7 }
  0x22   : > { %vm152_vm1 = vcmp.ne.s32.totalorder %v151_v9, 0  ;;  %vm153_vm2 = vcmp.lt.s32.totalorder %v151_v9, 0  ;;  %v155_v10 = vadd.s32 8, %v151_v9 }
  0x23   : > { %vm154_vm3 = vmand %vm153_vm2, %vm152_vm1 }
  0x24   : > { %v156_v12 = vsel %vm154_vm3, %v155_v10, %v151_v9 }
  0x25   : > { %vm157_vm4 = vcmp.eq.s32.totalorder %v156_v12, 0 }
  0x26   : > { %v158_v13 = vsel %vm157_vm4, 0.0, %v139_v11 }
  0x27   : > { %161 = vperm.xlu0 %300, %v158_v13  }
  0xa2   : > { %v162_v15 = vpop.permute.xlu0 %161 }
  0xa3   : > { %v171_v16 = vmul.f32 %v255_v14, %v162_v15 }
  0xa5   : > { %173 = vst.msk [vmem:[%s134_s4] sm:$0xff] %vm172_vm5, %v171_v16 }
  0xa6   : > { %314 = shalt.err (!%p311_p3)
}
  0xa7   : > { %s315_s22 = scalar_lea.hbm %s186_s8, 128  ;;  %s319_s25 = scalar_lea.hbm %s473_s2, 256 }
  0xa8   : > { %p316_p4 = scmp.ne.s32.totalorder %s186_s8, %s315_s22  ;;  %p320_p9 = scmp.lt.s32.totalorder %s186_s8, %s473_s2 }
  0xa9   : > { %p321_p10 = scmp.lt.s32.totalorder %s319_s25, %s315_s22 }
  0xaa   : > { %p317_p7 = pnand %p316_p4, %p418_p5 }
  0xab   : > { %p322_p11 = por %p321_p10, %p320_p9 }
  0xac   : > { %p318_p8 = pneg %p317_p7 }
  0xae   : > { %p323_p12 = pnand %p322_p11, %p318_p8 }
  0xb0   : > { %326 = shalt.err (!%p323_p12)
}
  0xb1   : > { %260 = dma.vmem_to_hbm [thread:$0]  (%p418_p5), %s189_s5, 128, %s186_s8, %s175_s14  }
  0xb2 PF: > { %p266_p13 = scmp.ge.s32.totalorder %s361_s12, 2  ;;  %s200_s28 = sand.u32 1, %s349_s9  }
  0xb3   : > { %s201_s29 = scalar_lea.sflag [#allocation3], %s200_s28 }
  0xb4   : > { %p263_p0 = pnand %p266_p13, %p422_p6 }
  0xb6   : > { %p264_p1 = pneg %p263_p0 }
  0xb8   : > { %344 = dma.done.wait (%p264_p1), %s201_s29, 128  }
  0xb9   : > { %346 = vsyncadd (%p264_p1), %s201_s29, 4294967168  ;;  %p12_p2 = scmp.ge.s32.totalorder %s405_s15, 4   ;;  %s476_s9 = smov %s353_s10 }
  0xba   : > { %s477_s10 = smov %s357_s11  ;;  %s478_s11 = smov %s416_s18 }
  0xbb   : > { %s479_s12 = smov %s405_s15  ;;  %14 = sbr.rel (!%p12_p2) target bundleno = 3 (0x3), region = 63 }
  0xc0   :  { %206 = vsyncpa [#allocation3], 1 }
  0xc1   :  { %208 = vsyncpa [#allocation3 + $0x1], 1 }

</bundles_post_ra>
